<compile_context>
chip_gen: v7x
topology: tpu7x:2x2x1
jax: 0.10.0
libtpu: 0.0.40
codegen_flags: <defaults>
</compile_context>

<pallas_src>
import math
import functools

import jax
import jax.numpy as jnp
from jax.experimental import pallas as pl
from jax.experimental.pallas import tpu as pltpu


_GATHER_SEMS = 8  # outstanding row DMAs on the gather path


def _round_up(x, m):
    return ((x + m - 1) // m) * m


def _tpu_vmem_capacity_bytes():
    try:
        info = pltpu.get_tpu_info()
        cap = getattr(info, "vmem_capacity_bytes", None)
        if cap:
            return int(cap)
    except Exception:
        pass
    return 128 * 1024 * 1024  # v5e/v6e default


# ---------------------------------------------------------------------------
# Path 1: small vocab -> VMEM-resident table, one-hot MXU matmul.
# ---------------------------------------------------------------------------
def _embedding_onehot_kernel(ids_ref, lut_ref, out_ref, *, scale):
    """ids_ref: (T,1) int32; lut_ref: (V,Dp) resident table; out_ref: (T,Dp)."""
    ids = ids_ref[...]                                        # (T, 1) int32
    tpb = ids.shape[0]
    n_token = lut_ref.shape[0]
    vocab = jax.lax.broadcasted_iota(jnp.int32, (tpb, n_token), 1)
    # One-hot in the table's native dtype ({0,1} exact in bf16) -> native-rate MXU.
    one_hot = (ids == vocab).astype(lut_ref.dtype)            # (T, V)
    emb = jnp.dot(one_hot, lut_ref[...],
                  preferred_element_type=jnp.float32)         # (T, Dp) f32 acc
    out_ref[...] = (emb * scale).astype(out_ref.dtype)


def _onehot_call(ids_col, lut_p, *, tpb, scale, vmem_limit, single_buffer_table):
    n_token, d_pad = lut_p.shape
    padded_total = ids_col.shape[0]

    if single_buffer_table:
        # Constant block index -> the second pipeline buffer is never used.
        lut_spec = pl.BlockSpec((n_token, d_pad), lambda i: (0, 0),
                                pipeline_mode=pl.Buffered(1))
    else:
        lut_spec = pl.BlockSpec((n_token, d_pad), lambda i: (0, 0))

    kernel = functools.partial(_embedding_onehot_kernel, scale=scale)
    return pl.pallas_call(
        kernel,
        out_shape=jax.ShapeDtypeStruct((padded_total, d_pad), lut_p.dtype),
        grid_spec=pltpu.PrefetchScalarGridSpec(
            num_scalar_prefetch=0,
            grid=(padded_total // tpb,),
            in_specs=[
                pl.BlockSpec((tpb, 1), lambda i: (i, 0)),   # token-id block
                lut_spec,                                   # resident table
            ],
            out_specs=pl.BlockSpec((tpb, d_pad), lambda i: (i, 0)),
        ),
        compiler_params=pltpu.CompilerParams(
            dimension_semantics=("parallel",),              # blocks independent
            vmem_limit_bytes=vmem_limit,
        ),
    )(ids_col, lut_p)


# ---------------------------------------------------------------------------
# Path 2: large vocab -> HBM table + manual DMA row gather.
# ---------------------------------------------------------------------------
def _embedding_gather_kernel(ids_ref, lut_hbm, out_ref, rows_ref, sems,
                             *, tpb, scale):
    """ids_ref: SMEM (N,) int32 (scalar-prefetched); lut_hbm: (V,Dp) in HBM;
    out_ref: (T,Dp) VMEM block; rows_ref: (T,Dp) VMEM scratch; sems: DMA sems."""
    base = pl.program_id(0) * tpb

    def _row_copy(t, slot):
        tok = ids_ref[base + t]
        return pltpu.make_async_copy(
            lut_hbm.at[pl.ds(tok, 1)],        # (1, Dp) row in HBM
            rows_ref.at[pl.ds(t, 1)],         # (1, Dp) row in VMEM
            sems.at[slot],
        )

    # Prime up to _GATHER_SEMS outstanding row DMAs (static trip count).
    for t in range(min(_GATHER_SEMS, tpb)):
        _row_copy(t, t % _GATHER_SEMS).start()

    def body(t, carry):
        slot = jax.lax.rem(t, _GATHER_SEMS)
        # Wait for row t (same transfer size as its start descriptor).
        pltpu.make_async_copy(
            lut_hbm.at[pl.ds(0, 1)],
            rows_ref.at[pl.ds(t, 1)],
            sems.at[slot],
        ).wait()

        @pl.when(t + _GATHER_SEMS < tpb)
        def _():
            _row_copy(t + _GATHER_SEMS, slot).start()

        return carry

    jax.lax.fori_loop(0, tpb, body, 0)

    out_ref[...] = (rows_ref[...].astype(jnp.float32) * scale).astype(out_ref.dtype)


def _gather_call(flat_ids, lut_p, *, tpb, scale, vmem_limit):
    n_token, d_pad = lut_p.shape
    padded_total = flat_ids.shape[0]

    kernel = functools.partial(_embedding_gather_kernel, tpb=tpb, scale=scale)
    return pl.pallas_call(
        kernel,
        out_shape=jax.ShapeDtypeStruct((padded_total, d_pad), lut_p.dtype),
        grid_spec=pltpu.PrefetchScalarGridSpec(
            num_scalar_prefetch=1,                          # ids -> SMEM
            grid=(padded_total // tpb,),
            in_specs=[pl.BlockSpec(memory_space=pl.ANY)],   # table stays in HBM
            out_specs=pl.BlockSpec((tpb, d_pad), lambda i, ids: (i, 0)),
            scratch_shapes=[
                pltpu.VMEM((tpb, d_pad), lut_p.dtype),      # gathered rows
                pltpu.SemaphoreType.DMA((_GATHER_SEMS,)),
            ],
        ),
        compiler_params=pltpu.CompilerParams(
            dimension_semantics=("parallel",),
            vmem_limit_bytes=vmem_limit,
        ),
    )(flat_ids, lut_p)


# ---------------------------------------------------------------------------
# Wrapper (module forward).
# ---------------------------------------------------------------------------
def embeddings_forward(ids, lut, *, tokens_per_block=None, onehot_max_vocab=256):
    """Pallas equivalent of `Embeddings.forward`: lut[ids] * sqrt(d_model)."""
    n_token, d_model = lut.shape
    orig_shape = ids.shape
    flat_ids = ids.reshape(-1).astype(jnp.int32)
    n_total = int(flat_ids.shape[0])

    cap = _tpu_vmem_capacity_bytes()
    budget = max(cap - 16 * 1024 * 1024, 8 * 1024 * 1024)
    if tokens_per_block is None:
        # v5e/v6e (128 MiB VMEM): 1024-token blocks; v7x (64 MiB/TC): 512.
        tokens_per_block = 1024 if cap >= 96 * 1024 * 1024 else 512

    # Clamp for tiny inputs (keep a multiple of 8 sublanes).
    tpb = min(tokens_per_block, _round_up(max(n_total, 1), 8))

    # Lane-dense output: pad d_model up to a multiple of 128 (sliced back below).
    d_pad = _round_up(d_model, 128)
    lut_p = lut if d_pad == d_model else jnp.pad(lut, ((0, 0), (0, d_pad - d_model)))
    esize = jnp.dtype(lut.dtype).itemsize
    scale = math.sqrt(d_model)

    use_onehot = n_token <= onehot_max_vocab

    def _need(tpb_):
        if use_onehot:
            return (2 * n_token * d_pad * esize                       # table buffers
                    + 2 * tpb_ * 128 * 4                              # (T,1) id blocks
                    + 2 * tpb_ * d_pad * esize                        # output buffers
                    + 2 * tpb_ * _round_up(n_token, 128) * esize)     # one-hot/acc temps
        return 3 * tpb_ * d_pad * esize + 2 * tpb_ * 128 * 4          # out bufs + rows

    # Shrink the token block if the working set would not fit in VMEM.
    while tpb > 256 and _need(tpb) > budget:
        tpb //= 2
    tpb = max(tpb, 8)

    padded_total = _round_up(n_total, tpb)
    if padded_total != n_total:
        flat_ids = jnp.pad(flat_ids, (0, padded_total - n_total))  # id 0 always valid

    vmem_limit = int(min(max(2 * _need(tpb), 8 * 1024 * 1024), budget))

    if use_onehot:
        ids_col = flat_ids.reshape(padded_total, 1)
        try:
            out = _onehot_call(ids_col, lut_p, tpb=tpb, scale=scale,
                               vmem_limit=vmem_limit, single_buffer_table=True)
        except Exception:
            # pl.Buffered / pipeline_mode unsupported here -> default buffering.
            out = _onehot_call(ids_col, lut_p, tpb=tpb, scale=scale,
                               vmem_limit=vmem_limit, single_buffer_table=False)
    else:
        out = _gather_call(flat_ids, lut_p, tpb=tpb, scale=scale,
                           vmem_limit=vmem_limit)

    if padded_total != n_total:
        out = out[:n_total]
    if d_pad != d_model:
        out = out[:, :d_model]
    return out.reshape(*orig_shape, d_model)


if __name__ == "__main__":
    key = jax.random.PRNGKey(0)
    k1, k2, k3, k4 = jax.random.split(key, 4)
    B, S = 2, 8

    # --- Path 1: small vocab (one-hot MXU path), module-consistent shapes. ---
    n_token, d_model = 16, 32
    lut = jax.random.normal(k1, (n_token, d_model), dtype=jnp.float32)
    ids = jax.random.randint(k2, (B, S), 0, n_token, dtype=jnp.int32)
    out = jax.block_until_ready(embeddings_forward(ids, lut))
    ref = jnp.take(lut, ids, axis=0) * math.sqrt(d_model)
    assert out.shape == (B, S, d_model)
    # rtol covers bf16-pass MXU rounding of f32 table values.
    assert jnp.allclose(out, ref, rtol=1e-2, atol=1e-3)

    # --- Path 2: larger vocab (HBM table + DMA row gather). ---
    n_token2, d_model2 = 2048, 128
    lut2 = jax.random.normal(k3, (n_token2, d_model2), dtype=jnp.float32)
    ids2 = jax.random.randint(k4, (B, S), 0, n_token2, dtype=jnp.int32)
    out2 = jax.block_until_ready(embeddings_forward(ids2, lut2))
    ref2 = jnp.take(lut2, ids2, axis=0) * math.sqrt(d_model2)
    assert out2.shape == (B, S, d_model2)
    assert jnp.allclose(out2, ref2, rtol=1e-5, atol=1e-5)

    print("KERNEL_OK")
</pallas_src>

<mosaic_0001>
module attributes {stable_mosaic.version = 11 : i64} {
  func.func @_embedding_onehot_kernel(%arg0: i32, %arg1: memref<16x1xi32, #tpu.memory_space<vmem>>, %arg2: memref<16x128xf32, #tpu.memory_space<vmem>>, %arg3: memref<16x128xf32, #tpu.memory_space<vmem>>) attributes {dimension_semantics = [#tpu.dimension_semantics<parallel>], iteration_bounds = array<i64: 1>, scalar_prefetch = 0 : i64, scratch_operands = 0 : i64, tpu.core_type = #tpu.core_type<tc>, window_params = [{transform_indices = @transform_0, window_bounds = array<i64: 16, 1>}, {pipeline_mode = #tpu.pipeline_mode<synchronous>, transform_indices = @transform_1, window_bounds = array<i64: 16, 128>}, {transform_indices = @transform_2, window_bounds = array<i64: 16, 128>}]} {
    %c0 = arith.constant 0 : index
    %c0_0 = arith.constant 0 : index
    %0 = vector.load %arg1[%c0, %c0_0] : memref<16x1xi32, #tpu.memory_space<vmem>>, vector<16x1xi32>
    %1 = tpu.iota {dimensions = array<i32: 1>} : vector<16x16xi32>
    %2 = vector.broadcast %0 : vector<16x1xi32> to vector<16x16xi32>
    %3 = arith.cmpi eq, %2, %1 : vector<16x16xi32>
    %4 = arith.extui %3 : vector<16x16xi1> to vector<16x16xi32>
    %5 = arith.sitofp %4 : vector<16x16xi32> to vector<16x16xf32>
    %c0_1 = arith.constant 0 : index
    %c0_2 = arith.constant 0 : index
    %6 = vector.load %arg2[%c0_1, %c0_2] : memref<16x128xf32, #tpu.memory_space<vmem>>, vector<16x128xf32>
    %cst = arith.constant dense<0.000000e+00> : vector<16x128xf32>
    %7 = tpu.matmul %5, %6, %cst {dimension_numbers = #tpu.dot_dimension_numbers<[1], [0], [0], [1], [0, 0, 1, 1], [], []>} : vector<16x16xf32>, vector<16x128xf32>, vector<16x128xf32> -> vector<16x128xf32>
    %cst_3 = arith.constant 5.65685415 : f32
    %8 = vector.broadcast %cst_3 : f32 to vector<16x128xf32>
    %9 = arith.mulf %7, %8 : vector<16x128xf32>
    %c0_4 = arith.constant 0 : index
    %c0_5 = arith.constant 0 : index
    %10 = vector.load %arg3[%c0_4, %c0_5] : memref<16x128xf32, #tpu.memory_space<vmem>>, vector<16x128xf32>
    tpu.vector_store %arg3[%c0_4, %c0_5], %9 {strides = array<i32>} : memref<16x128xf32, #tpu.memory_space<vmem>>, vector<16x128xf32>,
    return
  }
  func.func @transform_0(%arg0: i32) -> (i32, i32) {
    %c0_i32 = arith.constant 0 : i32
    %c0_i32_0 = arith.constant 0 : i32
    return %arg0, %c0_i32 : i32, i32
  }
  func.func @transform_1(%arg0: i32) -> (i32, i32) {
    %c0_i32 = arith.constant 0 : i32
    %c0_i32_0 = arith.constant 0 : i32
    %c0_i32_1 = arith.constant 0 : i32
    return %c0_i32, %c0_i32_0 : i32, i32
  }
  func.func @transform_2(%arg0: i32) -> (i32, i32) {
    %c0_i32 = arith.constant 0 : i32
    %c0_i32_0 = arith.constant 0 : i32
    return %arg0, %c0_i32 : i32, i32
  }
}

module attributes {stable_mosaic.version = 11 : i64} {
  func.func @_embedding_onehot_kernel(%arg0: i32, %arg1: memref<16x1xi32, #tpu.memory_space<vmem>>, %arg2: memref<16x128xf32, #tpu.memory_space<vmem>>, %arg3: memref<16x128xf32, #tpu.memory_space<vmem>>) attributes {dimension_semantics = [#tpu.dimension_semantics<parallel>], iteration_bounds = array<i64: 1>, scalar_prefetch = 0 : i64, scratch_operands = 0 : i64, tpu.core_type = #tpu.core_type<tc>, window_params = [{transform_indices = @transform_0, window_bounds = array<i64: 16, 1>}, {pipeline_mode = #tpu.pipeline_mode<synchronous>, transform_indices = @transform_1, window_bounds = array<i64: 16, 128>}, {transform_indices = @transform_2, window_bounds = array<i64: 16, 128>}]} {
    %c0 = arith.constant 0 : index
    %c0_0 = arith.constant 0 : index
    %0 = vector.load %arg1[%c0, %c0_0] : memref<16x1xi32, #tpu.memory_space<vmem>>, vector<16x1xi32>
    %1 = tpu.iota {dimensions = array<i32: 1>} : vector<16x16xi32>
    %2 = vector.broadcast %0 : vector<16x1xi32> to vector<16x16xi32>
    %3 = arith.cmpi eq, %2, %1 : vector<16x16xi32>
    %4 = arith.extui %3 : vector<16x16xi1> to vector<16x16xi32>
    %5 = arith.sitofp %4 : vector<16x16xi32> to vector<16x16xf32>
    %c0_1 = arith.constant 0 : index
    %c0_2 = arith.constant 0 : index
    %6 = vector.load %arg2[%c0_1, %c0_2] : memref<16x128xf32, #tpu.memory_space<vmem>>, vector<16x128xf32>
    %cst = arith.constant dense<0.000000e+00> : vector<16x128xf32>
    %7 = tpu.matmul %5, %6, %cst {dimension_numbers = #tpu.dot_dimension_numbers<[1], [0], [0], [1], [0, 0, 1, 1], [], []>} : vector<16x16xf32>, vector<16x128xf32>, vector<16x128xf32> -> vector<16x128xf32>
    %cst_3 = arith.constant 5.65685415 : f32
    %8 = vector.broadcast %cst_3 : f32 to vector<16x128xf32>
    %9 = arith.mulf %7, %8 : vector<16x128xf32>
    %c0_4 = arith.constant 0 : index
    %c0_5 = arith.constant 0 : index
    %10 = vector.load %arg3[%c0_4, %c0_5] : memref<16x128xf32, #tpu.memory_space<vmem>>, vector<16x128xf32>
    tpu.vector_store %arg3[%c0_4, %c0_5], %9 {strides = array<i32>} : memref<16x128xf32, #tpu.memory_space<vmem>>, vector<16x128xf32>,
    return
  }
  func.func @transform_0(%arg0: i32) -> (i32, i32) {
    %c0_i32 = arith.constant 0 : i32
    %c0_i32_0 = arith.constant 0 : i32
    return %arg0, %c0_i32 : i32, i32
  }
  func.func @transform_1(%arg0: i32) -> (i32, i32) {
    %c0_i32 = arith.constant 0 : i32
    %c0_i32_0 = arith.constant 0 : i32
    %c0_i32_1 = arith.constant 0 : i32
    return %c0_i32, %c0_i32_0 : i32, i32
  }
  func.func @transform_2(%arg0: i32) -> (i32, i32) {
    %c0_i32 = arith.constant 0 : i32
    %c0_i32_0 = arith.constant 0 : i32
    return %arg0, %c0_i32 : i32, i32
  }
}

</mosaic_0001>

<bundles_post_ra>
// kernel: tpu_custom_call.1
= control target key start
LH: loop header
LB: loop body
LE: loop exit
PB: predicated region body
PF: predicated region fallthrough
CT: control target
= control target key end

     0   :  { %s225_s0 = inlined_call_operand.vmem [shape: s32[16,1], index: 0, kind: input, shape index: {}]   ;;  %s226_s1 = inlined_call_operand.vmem [shape: f32[16,128], index: 1, kind: input, shape index: {}]   ;;  %s227_s2 = inlined_call_operand.hbm [shape: f32[16,128], index: 2, kind: output, shape index: {}]  }
   0x1   :  { %v12_v0 = vld [vmem:[%s225_s0] sm:$0xff] }
   0x2   :  { %7 = vsyncpa [#allocation3], 0  ;;  %v181_v1 = vmov 0   ;;  %v28_v2 = vld [vmem:[%s226_s1] sm:$0xff]  ;;  %v29_v3 = vld [vmem:[%s226_s1 + $0x8] sm:$0xff]  ;;  %v14_v6 = vlaneseq  ;;  %vm30_vm0 = vcmask 130048  }
   0x3   :  { %156 = vset.pattern.permute.xlu0 %v181_v1  ;;  %v147_v4 = vpack.c.bf16 %v29_v3, %v28_v2  ;;  %v13_v5 = vld [vmem:[%s225_s0 + $0x8] sm:$0xff]  ;;  %v182_v9 = vmov 0.0   ;;  %s183_s1 = smov [#allocation2]  }
   0x4   :  { %17 = vperm.xlu0 %156, %v12_v0   ;;  %v15_v7 = vand.u32 127, %v14_v6  ;;  %s121_s17 = sshll.u32 %s183_s1, 4  ;;  %s122_s17 = int_to_ptr.vmem [resolvable:$true] %s121_s17 }
   0x5   :  { %148 = vmatprep.subr.bf16.mxu0 %v147_v4  ;;  %s157_s0 = scalar_lea.vmem %s122_s17, 256  ;;  %p162_p1 = scmp.lt.s32.totalorder %s122_s17, %s122_s17 }
   0x6   :  { %150 = vmatpush3.bf16.msra.mxu0 %v147_v4  ;;  %p158_p0 = scmp.ne.s32.totalorder %s122_s17, %s157_s0  ;;  %p163_p2 = scmp.lt.s32.totalorder %s157_s0, %s157_s0 }
   0x8   :  { %20 = vperm.xlu0 %156, %v13_v5   ;;  %p164_p3 = por %p163_p2, %p162_p1 }
   0xa   :  { %p165_p4 = pnand %p164_p3, %p158_p0 }
  0x83   :  { %v18_v8 = vpop.permute.xlu0 %17 }
  0x84   :  { %vm22_vm1 = vcmp.eq.s32.totalorder %v18_v8, %v15_v7 }
  0x85   :  { %v132_v10 = vsel %vm22_vm1, 1.0, %v182_v9 }
  0x86   :  { %144 = vmatprep.mubr.msk.f32.mxu0 %vm30_vm0, %v132_v10 }
  0x87   :  { %v21_v11 = vpop.permute.xlu0 %20 }
  0x88   :  { %vm23_vm2 = vcmp.eq.s32.totalorder %v21_v11, %v15_v7 }
  0x89   :  { %v133_v12 = vsel %vm23_vm2, 1.0, %v182_v9 }
  0x8a   :  { %145 = vmatmul.mubr.msk.f32.vlgmr.msra.gmra.mrb[0].mxu0 %vm30_vm0, %v133_v12 }
 0x15d   :  { %v146_v13 = vpop.f32.mrb[0].mxu0 }
 0x15e   :  { %v113_v14 = vmul.f32 5.656854, %v146_v13  ;;  %v103_v15 = vpop.f32.mrb[1].mxu0 }
 0x15f   :  { %v112_v16 = vmul.f32 5.656854, %v103_v15 }
 0x160   :  { %115 = vst [vmem:[#allocation2 + $0x8] sm:$0xff] %v113_v14 }
 0x161   :  { %114 = vst [vmem:[#allocation2] sm:$0xff] %v112_v16 }
 0x162   :  { %168 = shalt.err (!%p165_p4)
}
 0x163   :  { %s169_s20 = scalar_lea.hbm %s227_s2, 256 }
 0x164   :  { %p170_p5 = scmp.ne.s32.totalorder %s227_s2, %s169_s20  ;;  %p173_p6 = scmp.lt.u32.totalorder %s169_s20, %s227_s2 }
 0x166   :  { %p175_p7 = pnand %p173_p6, %p170_p5 }
 0x168   :  { %178 = shalt.err (!%p175_p7)
}
 0x169   :  { %s184_s25 = smov 128   ;;  %s185_s26 = smov 8  }
 0x16a   :  { %127 = dma.vmem_to_hbm [thread:$0]  %s122_s17, 256, %s227_s2, [#allocation3], %s184_s25, %s184_s25, %s185_s26  }
 0x16b   :  { %179 = dma.done.wait [#allocation3], 256  }
 0x16c   :  { %180 = vsyncadd [#allocation3], 4294967040 }
 0x16d   :  { %131 = vsyncpa [#allocation3], 1 }

// kernel: tpu_custom_call.1
= control target key start
LH: loop header
LB: loop body
LE: loop exit
PB: predicated region body
PF: predicated region fallthrough
CT: control target
= control target key end

     0   :  { %s225_s0 = inlined_call_operand.vmem [shape: s32[16,1], index: 0, kind: input, shape index: {}]   ;;  %s226_s1 = inlined_call_operand.vmem [shape: f32[16,128], index: 1, kind: input, shape index: {}]   ;;  %s227_s2 = inlined_call_operand.hbm [shape: f32[16,128], index: 2, kind: output, shape index: {}]  }
   0x1   :  { %v12_v0 = vld [vmem:[%s225_s0] sm:$0xff] }
   0x2   :  { %7 = vsyncpa [#allocation3], 0  ;;  %v181_v1 = vmov 0   ;;  %v28_v2 = vld [vmem:[%s226_s1] sm:$0xff]  ;;  %v29_v3 = vld [vmem:[%s226_s1 + $0x8] sm:$0xff]  ;;  %v14_v6 = vlaneseq  ;;  %vm30_vm0 = vcmask 130048  }
   0x3   :  { %156 = vset.pattern.permute.xlu0 %v181_v1  ;;  %v147_v4 = vpack.c.bf16 %v29_v3, %v28_v2  ;;  %v13_v5 = vld [vmem:[%s225_s0 + $0x8] sm:$0xff]  ;;  %v182_v9 = vmov 0.0   ;;  %s183_s1 = smov [#allocation2]  }
   0x4   :  { %17 = vperm.xlu0 %156, %v12_v0   ;;  %v15_v7 = vand.u32 127, %v14_v6  ;;  %s121_s17 = sshll.u32 %s183_s1, 4  ;;  %s122_s17 = int_to_ptr.vmem [resolvable:$true] %s121_s17 }
   0x5   :  { %148 = vmatprep.subr.bf16.mxu0 %v147_v4  ;;  %s157_s0 = scalar_lea.vmem %s122_s17, 256  ;;  %p162_p1 = scmp.lt.s32.totalorder %s122_s17, %s122_s17 }
   0x6   :  { %150 = vmatpush3.bf16.msra.mxu0 %v147_v4  ;;  %p158_p0 = scmp.ne.s32.totalorder %s122_s17, %s157_s0  ;;  %p163_p2 = scmp.lt.s32.totalorder %s157_s0, %s157_s0 }
   0x8   :  { %20 = vperm.xlu0 %156, %v13_v5   ;;  %p164_p3 = por %p163_p2, %p162_p1 }
   0xa   :  { %p165_p4 = pnand %p164_p3, %p158_p0 }
  0x83   :  { %v18_v8 = vpop.permute.xlu0 %17 }
  0x84   :  { %vm22_vm1 = vcmp.eq.s32.totalorder %v18_v8, %v15_v7 }
  0x85   :  { %v132_v10 = vsel %vm22_vm1, 1.0, %v182_v9 }
  0x86   :  { %144 = vmatprep.mubr.msk.f32.mxu0 %vm30_vm0, %v132_v10 }
  0x87   :  { %v21_v11 = vpop.permute.xlu0 %20 }
  0x88   :  { %vm23_vm2 = vcmp.eq.s32.totalorder %v21_v11, %v15_v7 }
  0x89   :  { %v133_v12 = vsel %vm23_vm2, 1.0, %v182_v9 }
  0x8a   :  { %145 = vmatmul.mubr.msk.f32.vlgmr.msra.gmra.mrb[0].mxu0 %vm30_vm0, %v133_v12 }
 0x15d   :  { %v146_v13 = vpop.f32.mrb[0].mxu0 }
 0x15e   :  { %v113_v14 = vmul.f32 5.656854, %v146_v13  ;;  %v103_v15 = vpop.f32.mrb[1].mxu0 }
 0x15f   :  { %v112_v16 = vmul.f32 5.656854, %v103_v15 }
 0x160   :  { %115 = vst [vmem:[#allocation2 + $0x8] sm:$0xff] %v113_v14 }
 0x161   :  { %114 = vst [vmem:[#allocation2] sm:$0xff] %v112_v16 }
 0x162   :  { %168 = shalt.err (!%p165_p4)
}
 0x163   :  { %s169_s20 = scalar_lea.hbm %s227_s2, 256 }
 0x164   :  { %p170_p5 = scmp.ne.s32.totalorder %s227_s2, %s169_s20  ;;  %p173_p6 = scmp.lt.u32.totalorder %s169_s20, %s227_s2 }
 0x166   :  { %p175_p7 = pnand %p173_p6, %p170_p5 }
 0x168   :  { %178 = shalt.err (!%p175_p7)
}
 0x169   :  { %s184_s25 = smov 128   ;;  %s185_s26 = smov 8  }
 0x16a   :  { %127 = dma.vmem_to_hbm [thread:$0]  %s122_s17, 256, %s227_s2, [#allocation3], %s184_s25, %s184_s25, %s185_s26  }
 0x16b   :  { %179 = dma.done.wait [#allocation3], 256  }
 0x16c   :  { %180 = vsyncadd [#allocation3], 4294967040 }
 0x16d   :  { %131 = vsyncpa [#allocation3], 1 }

</bundles_post_ra>
